<compile_context>
chip_gen: v7x
topology: tpu7x:2x2x1
jax: 0.10.0
libtpu: 0.0.40
codegen_flags: <defaults>
</compile_context>

<pallas_src>
import functools

import jax
import jax.numpy as jnp
from jax import lax
from jax.experimental import pallas as pl
from jax.experimental.pallas import tpu as pltpu


def _dwsep_kernel(xf_ref, wdw_ref, bdw_ref, wpw_ref, bpw_ref, o_ref, *,
                  KH, KW, stride, Ho, Wo, Cout):
    # xf_ref : (Nb, KW, Hp, Wo*Cin)  per-kw-phase folded, padded input
    # wdw_ref: (KH*KW, Ho, Wo*Cin)   depthwise tap weights, pre-tiled over (Ho, Wo)
    # bdw_ref: (Ho, Wo*Cin)          depthwise bias, pre-tiled (seeds accumulator)
    # wpw_ref: (Wo*Cin, Wo*Cout)     block-diagonal pointwise (1x1) weight
    # bpw_ref: (1, Wo*Cout)          pointwise bias, pre-tiled
    # o_ref  : (Nb, Ho, Wo*Cout)     lane-dense output slab (Wo*Cout = 128 here)
    nb = xf_ref.shape[0]
    lane_in = xf_ref.shape[-1]                      # Wo*Cin

    # ---- depthwise conv (+ bias folded into the init) + ReLU ------------------
    acc = bdw_ref[...][None]                        # (1, Ho, Wo*Cin), f32
    for kh in range(KH):
        rows = pl.ds(kh, Ho) if stride == 1 else pl.ds(kh, Ho, stride=stride)
        for kw in range(KW):
            # aligned (Nb, Ho, Wo*Cin) load; strided rows come straight from the ref
            patch = xf_ref[:, kw, rows, :].astype(jnp.float32)
            acc = acc + patch * wdw_ref[kh * KW + kw]    # pure VPU mul + add
    h = jnp.maximum(acc, 0.0)                            # ReLU, (Nb, Ho, Wo*Cin)

    # ---- pointwise 1x1 conv as one MXU matmul (no accumulator relayout) -------
    h2 = h.reshape(nb * Ho, lane_in)                     # Ho % 8 == 0 -> free reshape
    out = jnp.dot(h2, wpw_ref[...], preferred_element_type=jnp.float32)
    out = out + bpw_ref[...]                             # (1, Wo*Cout) row broadcast
    o_ref[...] = out.reshape(nb, Ho, Wo * Cout).astype(o_ref.dtype)


def conv2d_depth_forward(x_nchw, w_dw, b_dw, w_pw, b_pw, *, stride=1, pad=0,
                         block_n=None):
    """Forward pass matching the PyTorch module.

    x_nchw: (N, Cin, H, W)
    w_dw  : (Cin, 1, KH, KW)   depthwise conv weight (PyTorch layout, groups=Cin)
    b_dw  : (Cin,)
    w_pw  : (Cout, Cin, 1, 1)  pointwise conv weight
    b_pw  : (Cout,)
    returns (N, Cout, Ho, Wo)  (NCHW, like PyTorch)
    """
    N, Cin, H, W = x_nchw.shape
    Cout = w_pw.shape[0]
    KH, KW = w_dw.shape[2], w_dw.shape[3]
    Hp, Wp = H + 2 * pad, W + 2 * pad
    Ho = (Hp - KH) // stride + 1
    Wo = (Wp - KW) // stride + 1
    f32 = jnp.float32

    # ---- wrapper glue (tiny tensors; XLA fuses this into one gather) ----------
    # NCHW -> NHWC, zero-pad, pre-gather the KW phases and fold W*Cin onto lanes.
    # TODO(synk): for large resolutions, do the fold/pad in-kernel (VMEM scratch)
    # and add an Ho row-block grid axis with halo DMAs so blocks fit v7x's 64 MiB.
    x_nhwc = jnp.transpose(x_nchw, (0, 2, 3, 1))
    xpad = jnp.pad(x_nhwc, ((0, 0), (pad, pad), (pad, pad), (0, 0)))
    span = (Wo - 1) * stride + 1
    xf = jnp.stack([xpad[:, :, kw:kw + span:stride, :] for kw in range(KW)],
                   axis=1)                                    # (N, KW, Hp, Wo, Cin)
    xf = xf.reshape(N, KW, Hp, Wo * Cin)

    # ---- batch blocking: Nb images / step, but keep >= 2 parallel grid steps ---
    if block_n is None:
        block_n = min(4, N)
    while block_n > 1 and pl.cdiv(N, block_n) < 2:            # feed both v7x TCs
        block_n //= 2
    n_steps = pl.cdiv(N, block_n)
    Np = n_steps * block_n
    if Np != N:
        xf = jnp.pad(xf, ((0, Np - N), (0, 0), (0, 0), (0, 0)))

    # ---- wrapper-prepared constants (biases folded in) -------------------------
    wdw = jnp.transpose(w_dw[:, 0, :, :], (1, 2, 0)).astype(f32)     # (KH, KW, Cin)
    wdw_tiled = jnp.tile(wdw.reshape(KH * KW, 1, 1, Cin),
                         (1, Ho, Wo, 1)).reshape(KH * KW, Ho, Wo * Cin)
    bdw_tiled = jnp.tile(b_dw.astype(f32).reshape(1, 1, Cin),
                         (Ho, Wo, 1)).reshape(Ho, Wo * Cin)
    wpw_mat = jnp.transpose(w_pw[:, :, 0, 0], (1, 0)).astype(f32)    # (Cin, Cout)
    # Block-diagonal weight: out[:, wo*Cout+co] = sum_ci acc[:, wo*Cin+ci]*wpw[ci,co]
    # (fine for the small channel counts of this module; for wide layers switch to
    #  a direct (M, Cin) @ (Cin, Cout) matmul instead).
    bigw = jnp.kron(jnp.eye(Wo, dtype=f32), wpw_mat)                 # (Wo*Cin, Wo*Cout)
    bpw_tiled = jnp.tile(b_pw.astype(f32).reshape(1, Cout), (1, Wo)) # (1, Wo*Cout)

    kernel = functools.partial(_dwsep_kernel, KH=KH, KW=KW, stride=stride,
                               Ho=Ho, Wo=Wo, Cout=Cout)

    out = pl.pallas_call(
        kernel,
        out_shape=jax.ShapeDtypeStruct((Np, Ho, Wo * Cout), x_nchw.dtype),
        grid_spec=pltpu.PrefetchScalarGridSpec(
            num_scalar_prefetch=0,
            grid=(n_steps,),
            in_specs=[
                pl.BlockSpec((block_n, KW, Hp, Wo * Cin), lambda i: (i, 0, 0, 0)),
                pl.BlockSpec((KH * KW, Ho, Wo * Cin), lambda i: (0, 0, 0)),
                pl.BlockSpec((Ho, Wo * Cin), lambda i: (0, 0)),
                pl.BlockSpec((Wo * Cin, Wo * Cout), lambda i: (0, 0)),
                pl.BlockSpec((1, Wo * Cout), lambda i: (0, 0)),
            ],
            out_specs=pl.BlockSpec((block_n, Ho, Wo * Cout), lambda i: (i, 0, 0)),
        ),
        compiler_params=pltpu.CompilerParams(
            dimension_semantics=("parallel",),
            vmem_limit_bytes=32 * 1024 * 1024),
    )(xf, wdw_tiled, bdw_tiled, bigw, bpw_tiled)

    out = out[:N].reshape(N, Ho, Wo, Cout)          # only the tiny output tensor
    return jnp.transpose(out, (0, 3, 1, 2))         # back to NCHW


def _reference(x, w_dw, b_dw, w_pw, b_pw, *, stride, pad):
    """Pure-JAX reference mirroring PyTorch's Conv2d semantics (NCHW/OIHW)."""
    Cin = x.shape[1]
    y = lax.conv_general_dilated(
        x, w_dw, window_strides=(stride, stride),
        padding=((pad, pad), (pad, pad)),
        dimension_numbers=("NCHW", "OIHW", "NCHW"),
        feature_group_count=Cin)
    y = y + b_dw.reshape(1, Cin, 1, 1)
    y = jnp.maximum(y, 0.0)
    z = lax.conv_general_dilated(
        y, w_pw, window_strides=(1, 1), padding=((0, 0), (0, 0)),
        dimension_numbers=("NCHW", "OIHW", "NCHW"))
    return z + b_pw.reshape(1, -1, 1, 1)


if __name__ == "__main__":
    # Small shapes consistent with the module: inp=4, oup=8, kernel=3, stride=1, pad=1.
    N, Cin, H, W = 2, 4, 16, 16
    Cout, K, stride, pad = 8, 3, 1, 1

    key = jax.random.PRNGKey(0)
    kx, k1, k2, k3, k4 = jax.random.split(key, 5)

    x = jax.random.normal(kx, (N, Cin, H, W), jnp.float32)
    w_dw = 0.1 * jax.random.normal(k1, (Cin, 1, K, K), jnp.float32)
    b_dw = 0.1 * jax.random.normal(k2, (Cin,), jnp.float32)
    w_pw = 0.1 * jax.random.normal(k3, (Cout, Cin, 1, 1), jnp.float32)
    b_pw = 0.1 * jax.random.normal(k4, (Cout,), jnp.float32)

    out = conv2d_depth_forward(x, w_dw, b_dw, w_pw, b_pw, stride=stride, pad=pad)
    out = jax.block_until_ready(out)

    ref = _reference(x, w_dw, b_dw, w_pw, b_pw, stride=stride, pad=pad)
    assert out.shape == ref.shape == (N, Cout, (H + 2 * pad - K) // stride + 1,
                                      (W + 2 * pad - K) // stride + 1)
    assert jnp.allclose(out, ref, atol=1e-4, rtol=1e-4), "mismatch vs reference"

    print("KERNEL_OK")
</pallas_src>

<mosaic_0001>
module attributes {stable_mosaic.version = 11 : i64} {
  func.func @_dwsep_kernel(%arg0: i32, %arg1: memref<1x3x18x64xf32, #tpu.memory_space<vmem>>, %arg2: memref<9x16x64xf32, #tpu.memory_space<vmem>>, %arg3: memref<16x64xf32, #tpu.memory_space<vmem>>, %arg4: memref<64x128xf32, #tpu.memory_space<vmem>>, %arg5: memref<1x128xf32, #tpu.memory_space<vmem>>, %arg6: memref<1x16x128xf32, #tpu.memory_space<vmem>>) attributes {dimension_semantics = [#tpu.dimension_semantics<parallel>], iteration_bounds = array<i64: 2>, scalar_prefetch = 0 : i64, scratch_operands = 0 : i64, tpu.core_type = #tpu.core_type<tc>, window_params = [{transform_indices = @transform_0, window_bounds = array<i64: 1, 3, 18, 64>}, {pipeline_mode = #tpu.pipeline_mode<synchronous>, transform_indices = @transform_1, window_bounds = array<i64: 9, 16, 64>}, {pipeline_mode = #tpu.pipeline_mode<synchronous>, transform_indices = @transform_2, window_bounds = array<i64: 16, 64>}, {pipeline_mode = #tpu.pipeline_mode<synchronous>, transform_indices = @transform_3, window_bounds = array<i64: 64, 128>}, {pipeline_mode = #tpu.pipeline_mode<synchronous>, transform_indices = @transform_4, window_bounds = array<i64: 1, 128>}, {transform_indices = @transform_5, window_bounds = array<i64: 1, 16, 128>}]} {
    %c0 = arith.constant 0 : index
    %c0_0 = arith.constant 0 : index
    %0 = vector.load %arg3[%c0, %c0_0] : memref<16x64xf32, #tpu.memory_space<vmem>>, vector<16x64xf32>
    %1 = vector.shape_cast %0 : vector<16x64xf32> to vector<1x16x64xf32>
    %c0_1 = arith.constant 0 : index
    %c0_2 = arith.constant 0 : index
    %c0_3 = arith.constant 0 : index
    %c0_4 = arith.constant 0 : index
    %2 = vector.load %arg1[%c0_1, %c0_2, %c0_3, %c0_4] : memref<1x3x18x64xf32, #tpu.memory_space<vmem>>, vector<1x1x16x64xf32>
    %3 = vector.shape_cast %2 : vector<1x1x16x64xf32> to vector<1x16x64xf32>
    %c0_5 = arith.constant 0 : index
    %c0_6 = arith.constant 0 : index
    %c0_7 = arith.constant 0 : index
    %4 = vector.load %arg2[%c0_5, %c0_6, %c0_7] : memref<9x16x64xf32, #tpu.memory_space<vmem>>, vector<1x16x64xf32>
    %5 = vector.shape_cast %4 : vector<1x16x64xf32> to vector<16x64xf32>
    %6 = vector.shape_cast %5 : vector<16x64xf32> to vector<1x16x64xf32>
    %7 = arith.mulf %3, %6 : vector<1x16x64xf32>
    %8 = arith.addf %1, %7 : vector<1x16x64xf32>
    %c0_8 = arith.constant 0 : index
    %c1 = arith.constant 1 : index
    %c0_9 = arith.constant 0 : index
    %c0_10 = arith.constant 0 : index
    %9 = vector.load %arg1[%c0_8, %c1, %c0_9, %c0_10] : memref<1x3x18x64xf32, #tpu.memory_space<vmem>>, vector<1x1x16x64xf32>
    %10 = vector.shape_cast %9 : vector<1x1x16x64xf32> to vector<1x16x64xf32>
    %c1_11 = arith.constant 1 : index
    %c0_12 = arith.constant 0 : index
    %c0_13 = arith.constant 0 : index
    %11 = vector.load %arg2[%c1_11, %c0_12, %c0_13] : memref<9x16x64xf32, #tpu.memory_space<vmem>>, vector<1x16x64xf32>
    %12 = vector.shape_cast %11 : vector<1x16x64xf32> to vector<16x64xf32>
    %13 = vector.shape_cast %12 : vector<16x64xf32> to vector<1x16x64xf32>
    %14 = arith.mulf %10, %13 : vector<1x16x64xf32>
    %15 = arith.addf %8, %14 : vector<1x16x64xf32>
    %c0_14 = arith.constant 0 : index
    %c2 = arith.constant 2 : index
    %c0_15 = arith.constant 0 : index
    %c0_16 = arith.constant 0 : index
    %16 = vector.load %arg1[%c0_14, %c2, %c0_15, %c0_16] : memref<1x3x18x64xf32, #tpu.memory_space<vmem>>, vector<1x1x16x64xf32>
    %17 = vector.shape_cast %16 : vector<1x1x16x64xf32> to vector<1x16x64xf32>
    %c2_17 = arith.constant 2 : index
    %c0_18 = arith.constant 0 : index
    %c0_19 = arith.constant 0 : index
    %18 = vector.load %arg2[%c2_17, %c0_18, %c0_19] : memref<9x16x64xf32, #tpu.memory_space<vmem>>, vector<1x16x64xf32>
    %19 = vector.shape_cast %18 : vector<1x16x64xf32> to vector<16x64xf32>
    %20 = vector.shape_cast %19 : vector<16x64xf32> to vector<1x16x64xf32>
    %21 = arith.mulf %17, %20 : vector<1x16x64xf32>
    %22 = arith.addf %15, %21 : vector<1x16x64xf32>
    %c0_20 = arith.constant 0 : index
    %c0_21 = arith.constant 0 : index
    %c1_22 = arith.constant 1 : index
    %c0_23 = arith.constant 0 : index
    %23 = vector.load %arg1[%c0_20, %c0_21, %c1_22, %c0_23] : memref<1x3x18x64xf32, #tpu.memory_space<vmem>>, vector<1x1x16x64xf32>
    %24 = vector.shape_cast %23 : vector<1x1x16x64xf32> to vector<1x16x64xf32>
    %c3 = arith.constant 3 : index
    %c0_24 = arith.constant 0 : index
    %c0_25 = arith.constant 0 : index
    %25 = vector.load %arg2[%c3, %c0_24, %c0_25] : memref<9x16x64xf32, #tpu.memory_space<vmem>>, vector<1x16x64xf32>
    %26 = vector.shape_cast %25 : vector<1x16x64xf32> to vector<16x64xf32>
    %27 = vector.shape_cast %26 : vector<16x64xf32> to vector<1x16x64xf32>
    %28 = arith.mulf %24, %27 : vector<1x16x64xf32>
    %29 = arith.addf %22, %28 : vector<1x16x64xf32>
    %c0_26 = arith.constant 0 : index
    %c1_27 = arith.constant 1 : index
    %c1_28 = arith.constant 1 : index
    %c0_29 = arith.constant 0 : index
    %30 = vector.load %arg1[%c0_26, %c1_27, %c1_28, %c0_29] : memref<1x3x18x64xf32, #tpu.memory_space<vmem>>, vector<1x1x16x64xf32>
    %31 = vector.shape_cast %30 : vector<1x1x16x64xf32> to vector<1x16x64xf32>
    %c4 = arith.constant 4 : index
    %c0_30 = arith.constant 0 : index
    %c0_31 = arith.constant 0 : index
    %32 = vector.load %arg2[%c4, %c0_30, %c0_31] : memref<9x16x64xf32, #tpu.memory_space<vmem>>, vector<1x16x64xf32>
    %33 = vector.shape_cast %32 : vector<1x16x64xf32> to vector<16x64xf32>
    %34 = vector.shape_cast %33 : vector<16x64xf32> to vector<1x16x64xf32>
    %35 = arith.mulf %31, %34 : vector<1x16x64xf32>
    %36 = arith.addf %29, %35 : vector<1x16x64xf32>
    %c0_32 = arith.constant 0 : index
    %c2_33 = arith.constant 2 : index
    %c1_34 = arith.constant 1 : index
    %c0_35 = arith.constant 0 : index
    %37 = vector.load %arg1[%c0_32, %c2_33, %c1_34, %c0_35] : memref<1x3x18x64xf32, #tpu.memory_space<vmem>>, vector<1x1x16x64xf32>
    %38 = vector.shape_cast %37 : vector<1x1x16x64xf32> to vector<1x16x64xf32>
    %c5 = arith.constant 5 : index
    %c0_36 = arith.constant 0 : index
    %c0_37 = arith.constant 0 : index
    %39 = vector.load %arg2[%c5, %c0_36, %c0_37] : memref<9x16x64xf32, #tpu.memory_space<vmem>>, vector<1x16x64xf32>
    %40 = vector.shape_cast %39 : vector<1x16x64xf32> to vector<16x64xf32>
    %41 = vector.shape_cast %40 : vector<16x64xf32> to vector<1x16x64xf32>
    %42 = arith.mulf %38, %41 : vector<1x16x64xf32>
    %43 = arith.addf %36, %42 : vector<1x16x64xf32>
    %c0_38 = arith.constant 0 : index
    %c0_39 = arith.constant 0 : index
    %c2_40 = arith.constant 2 : index
    %c0_41 = arith.constant 0 : index
    %44 = vector.load %arg1[%c0_38, %c0_39, %c2_40, %c0_41] : memref<1x3x18x64xf32, #tpu.memory_space<vmem>>, vector<1x1x16x64xf32>
    %45 = vector.shape_cast %44 : vector<1x1x16x64xf32> to vector<1x16x64xf32>
    %c6 = arith.constant 6 : index
    %c0_42 = arith.constant 0 : index
    %c0_43 = arith.constant 0 : index
    %46 = vector.load %arg2[%c6, %c0_42, %c0_43] : memref<9x16x64xf32, #tpu.memory_space<vmem>>, vector<1x16x64xf32>
    %47 = vector.shape_cast %46 : vector<1x16x64xf32> to vector<16x64xf32>
    %48 = vector.shape_cast %47 : vector<16x64xf32> to vector<1x16x64xf32>
    %49 = arith.mulf %45, %48 : vector<1x16x64xf32>
    %50 = arith.addf %43, %49 : vector<1x16x64xf32>
    %c0_44 = arith.constant 0 : index
    %c1_45 = arith.constant 1 : index
    %c2_46 = arith.constant 2 : index
    %c0_47 = arith.constant 0 : index
    %51 = vector.load %arg1[%c0_44, %c1_45, %c2_46, %c0_47] : memref<1x3x18x64xf32, #tpu.memory_space<vmem>>, vector<1x1x16x64xf32>
    %52 = vector.shape_cast %51 : vector<1x1x16x64xf32> to vector<1x16x64xf32>
    %c7 = arith.constant 7 : index
    %c0_48 = arith.constant 0 : index
    %c0_49 = arith.constant 0 : index
    %53 = vector.load %arg2[%c7, %c0_48, %c0_49] : memref<9x16x64xf32, #tpu.memory_space<vmem>>, vector<1x16x64xf32>
    %54 = vector.shape_cast %53 : vector<1x16x64xf32> to vector<16x64xf32>
    %55 = vector.shape_cast %54 : vector<16x64xf32> to vector<1x16x64xf32>
    %56 = arith.mulf %52, %55 : vector<1x16x64xf32>
    %57 = arith.addf %50, %56 : vector<1x16x64xf32>
    %c0_50 = arith.constant 0 : index
    %c2_51 = arith.constant 2 : index
    %c2_52 = arith.constant 2 : index
    %c0_53 = arith.constant 0 : index
    %58 = vector.load %arg1[%c0_50, %c2_51, %c2_52, %c0_53] : memref<1x3x18x64xf32, #tpu.memory_space<vmem>>, vector<1x1x16x64xf32>
    %59 = vector.shape_cast %58 : vector<1x1x16x64xf32> to vector<1x16x64xf32>
    %c8 = arith.constant 8 : index
    %c0_54 = arith.constant 0 : index
    %c0_55 = arith.constant 0 : index
    %60 = vector.load %arg2[%c8, %c0_54, %c0_55] : memref<9x16x64xf32, #tpu.memory_space<vmem>>, vector<1x16x64xf32>
    %61 = vector.shape_cast %60 : vector<1x16x64xf32> to vector<16x64xf32>
    %62 = vector.shape_cast %61 : vector<16x64xf32> to vector<1x16x64xf32>
    %63 = arith.mulf %59, %62 : vector<1x16x64xf32>
    %64 = arith.addf %57, %63 : vector<1x16x64xf32>
    %cst = arith.constant 0.000000e+00 : f32
    %65 = vector.broadcast %cst : f32 to vector<1x16x64xf32>
    %66 = arith.maximumf %64, %65 : vector<1x16x64xf32>
    %67 = vector.shape_cast %66 : vector<1x16x64xf32> to vector<16x64xf32>
    %c0_56 = arith.constant 0 : index
    %c0_57 = arith.constant 0 : index
    %68 = vector.load %arg4[%c0_56, %c0_57] : memref<64x128xf32, #tpu.memory_space<vmem>>, vector<64x128xf32>
    %cst_58 = arith.constant dense<0.000000e+00> : vector<16x128xf32>
    %69 = tpu.matmul %67, %68, %cst_58 {dimension_numbers = #tpu.dot_dimension_numbers<[1], [0], [0], [1], [0, 0, 1, 1], [], []>} : vector<16x64xf32>, vector<64x128xf32>, vector<16x128xf32> -> vector<16x128xf32>
    %c0_59 = arith.constant 0 : index
    %c0_60 = arith.constant 0 : index
    %70 = vector.load %arg5[%c0_59, %c0_60] : memref<1x128xf32, #tpu.memory_space<vmem>>, vector<1x128xf32>
    %71 = vector.broadcast %70 : vector<1x128xf32> to vector<16x128xf32>
    %72 = arith.addf %69, %71 : vector<16x128xf32>
    %73 = vector.shape_cast %72 : vector<16x128xf32> to vector<1x16x128xf32>
    %c0_61 = arith.constant 0 : index
    %c0_62 = arith.constant 0 : index
    %c0_63 = arith.constant 0 : index
    %74 = vector.load %arg6[%c0_61, %c0_62, %c0_63] : memref<1x16x128xf32, #tpu.memory_space<vmem>>, vector<1x16x128xf32>
    tpu.vector_store %arg6[%c0_61, %c0_62, %c0_63], %73 {strides = array<i32>} : memref<1x16x128xf32, #tpu.memory_space<vmem>>, vector<1x16x128xf32>,
    return
  }
  func.func @transform_0(%arg0: i32) -> (i32, i32, i32, i32) {
    %c0_i32 = arith.constant 0 : i32
    %c0_i32_0 = arith.constant 0 : i32
    %c0_i32_1 = arith.constant 0 : i32
    %c0_i32_2 = arith.constant 0 : i32
    return %arg0, %c0_i32, %c0_i32_0, %c0_i32_1 : i32, i32, i32, i32
  }
  func.func @transform_1(%arg0: i32) -> (i32, i32, i32) {
    %c0_i32 = arith.constant 0 : i32
    %c0_i32_0 = arith.constant 0 : i32
    %c0_i32_1 = arith.constant 0 : i32
    %c0_i32_2 = arith.constant 0 : i32
    return %c0_i32, %c0_i32_0, %c0_i32_1 : i32, i32, i32
  }
  func.func @transform_2(%arg0: i32) -> (i32, i32) {
    %c0_i32 = arith.constant 0 : i32
    %c0_i32_0 = arith.constant 0 : i32
    %c0_i32_1 = arith.constant 0 : i32
    return %c0_i32, %c0_i32_0 : i32, i32
  }
  func.func @transform_3(%arg0: i32) -> (i32, i32) {
    %c0_i32 = arith.constant 0 : i32
    %c0_i32_0 = arith.constant 0 : i32
    %c0_i32_1 = arith.constant 0 : i32
    return %c0_i32, %c0_i32_0 : i32, i32
  }
  func.func @transform_4(%arg0: i32) -> (i32, i32) {
    %c0_i32 = arith.constant 0 : i32
    %c0_i32_0 = arith.constant 0 : i32
    %c0_i32_1 = arith.constant 0 : i32
    return %c0_i32, %c0_i32_0 : i32, i32
  }
  func.func @transform_5(%arg0: i32) -> (i32, i32, i32) {
    %c0_i32 = arith.constant 0 : i32
    %c0_i32_0 = arith.constant 0 : i32
    %c0_i32_1 = arith.constant 0 : i32
    return %arg0, %c0_i32, %c0_i32_0 : i32, i32, i32
  }
}

</mosaic_0001>

<bundles_post_ra>
// kernel: tpu_custom_call.1
= control target key start
LH: loop header
LB: loop body
LE: loop exit
PB: predicated region body
PF: predicated region fallthrough
CT: control target
= control target key end

     0   :  { %10 = vsyncpa [#allocation3], 0  ;;  %s921_s0 = inlined_call_operand.vmem [shape: f32[2,3,18,64], index: 0, kind: input, shape index: {}]   ;;  %s922_s1 = inlined_call_operand.vmem [shape: f32[9,16,64], index: 1, kind: input, shape index: {}]   ;;  %s923_s2 = inlined_call_operand.vmem [shape: f32[16,64], index: 2, kind: input, shape index: {}]   ;;  %s924_s3 = inlined_call_operand.vmem [shape: f32[64,128], index: 3, kind: input, shape index: {}]   ;;  %s925_s4 = inlined_call_operand.vmem [shape: f32[1,128], index: 4, kind: input, shape index: {}]   ;;  %s926_s5 = inlined_call_operand.hbm [shape: f32[2,16,128], index: 5, kind: output, shape index: {}]  }
   0x1   :  { %12 = vsyncpa [#allocation3 + $0x1], 0  ;;  %s711_s18 = smov 0   ;;  %s713_s19 = smov 0  }
   0x2   :  { %s715_s20 = smov 0   ;;  %s717_s21 = smov 0  }
   0x3 LB: > { %s732_s22 = sadd.s32 4294967295, %s676_s21   ;;  %s484_s23 = sadd.s32 4294967294, %s676_s21   ;;  %s676_s21 = sphi %s717_s21, %s932_s21   ;;  %s672_s20 = sphi %s715_s20, %s931_s20   ;;  %s668_s19 = sphi %s713_s19, %s930_s19   ;;  %s664_s18 = sphi %s711_s18, %s929_s18  }
   0x4   : > { %s736_s24 = sadd.s32 1, %s676_s21   ;;  %s135_s25 = sadd.s32 1, %s672_s20 }
   0x5   : > { %s132_s26 = ssub.s32 %s676_s21, %s736_s24  ;;  %p145_p0 = scmp.ne.s32.totalorder %s672_s20, %s668_s19 }
   0x6   : > { %p133_p1 = scmp.eq.s32.totalorder %s132_s26, 0  ;;  %p146_p2 = scmp.eq.s32.totalorder %s732_s22, 1 }
   0x7   : > { %p151_p3 = scmp.ne.s32.totalorder %s668_s19, %s664_s18  ;;  %p152_p4 = scmp.eq.s32.totalorder %s484_s23, 1 }
   0x8   : > { %s747_s27 = scalar_select %p133_p1, %s672_s20, %s135_s25  }
   0x9   : > { %p749_p5 = por %p146_p2, %p145_p0  ;;  %p753_p6 = por %p152_p4, %p151_p3 }
   0xa   : > { %p487_p7 = scmp.ge.s32.totalorder %s676_s21, 1  ;;  %p190_p8 = scmp.lt.s32.totalorder %s676_s21, 3 }
   0xc   : > { %p191_p9 = pnand %p487_p7, %p190_p8 }
   0xd   : > { %v309_v0 = vld [vmem:[%s924_s3] sm:$0xff] (!%p191_p9)  ;;  %v310_v1 = vld [vmem:[%s924_s3 + $0x8] sm:$0xff] (!%p191_p9)  ;;  %v311_v2 = vld [vmem:[%s924_s3 + $0x10] sm:$0xff] (!%p191_p9)  ;;  %p218_p10 = scmp.lt.s32.totalorder (!%p191_p9), %s732_s22, 1  ;;  %vm324_vm0 = vcmask (!%p191_p9), 523264   ;;  %s215_s26 = sand.u32 (!%p191_p9), 1, %s668_s19  }
   0xe   : > { %194 = sbr.rel (%p191_p9) target bundleno = 281 (0x119), region = 40  ;;  %v556_v3 = vpack.c.bf16 (!%p191_p9), %v310_v1, %v309_v0  ;;  %v312_v4 = vld [vmem:[%s924_s3 + $0x18] sm:$0xff] (!%p191_p9)  ;;  %v313_v6 = vld [vmem:[%s924_s3 + $0x20] sm:$0xff] (!%p191_p9)  ;;  %v314_v7 = vld [vmem:[%s924_s3 + $0x28] sm:$0xff] (!%p191_p9)  ;;  %s526_s9 = sshll.u32 (!%p191_p9), %s732_s22, 8 }
   0xf   : > { %v560_v5 = vpack.c.bf16 (!%p191_p9), %v312_v4, %v311_v2  ;;  %v564_v8 = vpack.c.bf16 (!%p191_p9), %v314_v7, %v313_v6  ;;  %v315_v9 = vld [vmem:[%s924_s3 + $0x30] sm:$0xff] (!%p191_p9)  ;;  %v227_v10 = vld [vmem:[%s922_s1] sm:$0xff] (!%p191_p9)  ;;  %v316_v12 = vld [vmem:[%s924_s3 + $0x38] sm:$0xff] (!%p191_p9)  ;;  %s878_s12 = scalar_lea.hbm (!%p191_p9), %s926_s5, %s526_s9  ;;  %s880_s14 = scalar_lea.sflag (!%p191_p9), [#allocation3], %s215_s26 }
  0x10   : > { %557 = vmatprep.subr.bf16.mxu0 (!%p191_p9), %v556_v3  ;;  %v492_v11 = vld [vmem:[%s922_s1 + $0x10] sm:$0xff] (!%p191_p9)  ;;  %v223_v13 = vld [vmem:[%s923_s2] sm:$0xff] (!%p191_p9)  ;;  %v228_v20 = vld [vmem:[%s922_s1 + $0x8] sm:$0xff] (!%p191_p9)  ;;  %v568_v22 = vpack.c.bf16 (!%p191_p9), %v316_v12, %v315_v9 }
  0x11   : > { %559 = vmatpush3.bf16.msra.mxu0 (!%p191_p9), %v556_v3  ;;  %v496_v14 = vld [vmem:[%s922_s1 + $0x20] sm:$0xff] (!%p191_p9)  ;;  %v493_v21 = vld [vmem:[%s922_s1 + $0x18] sm:$0xff] (!%p191_p9)  ;;  %v498_v24 = vld [vmem:[%s922_s1 + $0x30] sm:$0xff] (!%p191_p9) }
  0x12   : > { %561 = vmatprep.subr.bf16.mxu0 (!%p191_p9), %v560_v5  ;;  %v224_v25 = vld [vmem:[%s923_s2 + $0x8] sm:$0xff] (!%p191_p9)  ;;  %v502_v32 = vld [vmem:[%s922_s1 + $0x40] sm:$0xff] (!%p191_p9)  ;;  %v499_v39 = vld [vmem:[%s922_s1 + $0x38] sm:$0xff] (!%p191_p9) }
  0x13   : > { %v497_v35 = vld [vmem:[%s922_s1 + $0x28] sm:$0xff] (!%p191_p9)  ;;  %v506_v41 = vld [vmem:[%s922_s1 + $0x50] sm:$0xff] (!%p191_p9)  ;;  %v508_v49 = vld [vmem:[%s922_s1 + $0x60] sm:$0xff] (!%p191_p9) }
  0x14   : > { %v503_v47 = vld [vmem:[%s922_s1 + $0x48] sm:$0xff] (!%p191_p9)  ;;  %v507_v55 = vld [vmem:[%s922_s1 + $0x58] sm:$0xff] (!%p191_p9)  ;;  %v512_v57 = vld [vmem:[%s922_s1 + $0x70] sm:$0xff] (!%p191_p9) }
  0x15   : > { %s219_s17 = scalar_select %p218_p10, %s732_s22, 1  ;;  %563 = vmatpush3.bf16.msra.mxu0 %v560_v5  ;;  %v509_v63 = vld [vmem:[%s922_s1 + $0x68] sm:$0xff]  ;;  %v516_v1 = vld [vmem:[%s922_s1 + $0x80] sm:$0xff]  ;;  %v513_v7 = vld [vmem:[%s922_s1 + $0x78] sm:$0xff] }
  0x16   : > { %565 = vmatprep.subr.bf16.mxu0 %v564_v8  ;;  %s678_s22 = smov [#allocation2]  }
  0x17   : > { %s572_s23 = smul.u32 72, %s219_s17  ;;  %s618_s16 = sshll.u32 %s678_s22, 4  ;;  %s619_s16 = int_to_ptr.vmem [resolvable:$false] %s618_s16 }
  0x18   : > { %s620_s17 = scalar_lea.vmem %s619_s16, 512 }
  0x19   : > { %s794_s13 = scalar_lea.vmem %s921_s0, %s572_s23  ;;  %567 = vmatpush3.bf16.msra.mxu0 %v564_v8 }
  0x1a   : > { %v225_v15 = vld [vmem:[%s794_s13] sm:$0xff]  ;;  %v490_v16 = vld [vmem:[%s794_s13 + $0x18] sm:$0xff]  ;;  %v494_v17 = vld [vmem:[%s794_s13 + $0x30] sm:$0xff]  ;;  %569 = vmatprep.subr.bf16.mxu0 %v568_v22 }
  0x1b   : > { %v229_v18 = vmul.f32 %v227_v10, %v225_v15  ;;  %v239_v19 = vmul.f32 %v492_v11, %v490_v16  ;;  %v253_v23 = vld [vmem:[%s794_s13 + $0x1] sm:$0xff]  ;;  %v249_v27 = vmul.f32 %v496_v14, %v494_v17  ;;  %v495_v30 = vld [vmem:[%s794_s13 + $0x38] sm:$0xff]  ;;  %v254_v38 = vld [vmem:[%s794_s13 + $0x9] sm:$0xff] }
  0x1c   : > { %v226_v28 = vld [vmem:[%s794_s13 + $0x8] sm:$0xff]  ;;  %v491_v29 = vld [vmem:[%s794_s13 + $0x20] sm:$0xff]  ;;  %v258_v37 = vmul.f32 %v498_v24, %v253_v23  ;;  %v504_v40 = vld [vmem:[%s794_s13 + $0x31] sm:$0xff]  ;;  %v250_v43 = vmul.f32 %v497_v35, %v495_v30  ;;  %v259_v51 = vmul.f32 %v499_v39, %v254_v38 }
  0x1d   : > { %v231_v26 = vadd.f32 %v229_v18, %v223_v13  ;;  %v500_v31 = vld [vmem:[%s794_s13 + $0x19] sm:$0xff]  ;;  %v230_v33 = vmul.f32 %v228_v20, %v226_v28  ;;  %v240_v34 = vmul.f32 %v493_v21, %v491_v29  ;;  %v501_v46 = vld [vmem:[%s794_s13 + $0x21] sm:$0xff]  ;;  %571 = vmatpush3.bf16.msra.mxu0 %v568_v22  ;;  %v276_v53 = vmul.f32 %v506_v41, %v504_v40  ;;  %v281_v62 = vld [vmem:[%s794_s13 + $0xa] sm:$0xff] }
  0x1e   : > { %v267_v45 = vmul.f32 %v502_v32, %v500_v31  ;;  %v280_v48 = vld [vmem:[%s794_s13 + $0x2] sm:$0xff]  ;;  %v505_v54 = vld [vmem:[%s794_s13 + $0x39] sm:$0xff]  ;;  %v268_v59 = vmul.f32 %v503_v47, %v501_v46  ;;  %v286_v9 = vmul.f32 %v509_v63, %v281_v62 }
  0x1f   : > { %v241_v36 = vadd.f32 %v239_v19, %v231_v26  ;;  %v232_v42 = vadd.f32 %v230_v33, %v224_v25  ;;  %v510_v56 = vld [vmem:[%s794_s13 + $0x1a] sm:$0xff]  ;;  %v285_v61 = vmul.f32 %v508_v49, %v280_v48  ;;  %v514_v0 = vld [vmem:[%s794_s13 + $0x32] sm:$0xff]  ;;  %v277_v3 = vmul.f32 %v507_v55, %v505_v54  ;;  %v511_v6 = vld [vmem:[%s794_s13 + $0x22] sm:$0xff] }
  0x20   : > { %v294_v5 = vmul.f32 %v512_v57, %v510_v56  ;;  %v303_v11 = vmul.f32 %v516_v1, %v514_v0  ;;  %v515_v12 = vld [vmem:[%s794_s13 + $0x3a] sm:$0xff]  ;;  %v517_v13 = vld [vmem:[%s922_s1 + $0x88] sm:$0xff]  ;;  %v295_v15 = vmul.f32 %v513_v7, %v511_v6  ;;  %s488_s13 = sshll.u32 %s215_s26, 4 }
  0x21   : > { %v251_v44 = vadd.f32 %v249_v27, %v241_v36  ;;  %v242_v50 = vadd.f32 %v240_v34, %v232_v42  ;;  %v304_v18 = vmul.f32 %v517_v13, %v515_v12  ;;  %v518_v24 = vld [vmem:[%s925_s4] ss:$0 sm:$0xff]  ;;  %s217_s7 = scalar_lea.vmem [#allocation2], %s488_s13 }
  0x22   : > { %s422_s8 = sshll.u32 %s217_s7, 4  ;;  %s873_s8 = int_to_ptr.vmem [resolvable:$true] %s422_s8 }
  0x23   : > { %v260_v52 = vadd.f32 %v258_v37, %v251_v44  ;;  %v252_v58 = vadd.f32 %v250_v43, %v242_v50  ;;  %s614_s15 = scalar_lea.vmem %s873_s8, 256  ;;  %p621_p0 = scmp.lt.s32.totalorder %s873_s8, %s619_s16 }
  0x24   : > { %p615_p11 = scmp.ne.s32.totalorder %s873_s8, %s614_s15  ;;  %p622_p1 = scmp.lt.s32.totalorder %s620_s17, %s614_s15 }
  0x25   : > { %v269_v60 = vadd.f32 %v267_v45, %v260_v52  ;;  %v261_v2 = vadd.f32 %v259_v51, %v252_v58 }
  0x26   : > { %p616_p12 = pnand %p615_p11, %p749_p5  ;;  %p623_p2 = por %p622_p1, %p621_p0 }
  0x27   : > { %v278_v4 = vadd.f32 %v276_v53, %v269_v60  ;;  %v270_v8 = vadd.f32 %v268_v59, %v261_v2 }
  0x28   : > { %p617_p13 = pneg %p616_p12 }
  0x29   : > { %v287_v10 = vadd.f32 %v285_v61, %v278_v4  ;;  %v279_v14 = vadd.f32 %v277_v3, %v270_v8 }
  0x2a   : > { %p624_p3 = pnand %p623_p2, %p617_p13 }
  0x2b   : > { %v296_v16 = vadd.f32 %v294_v5, %v287_v10  ;;  %v288_v17 = vadd.f32 %v286_v9, %v279_v14 }
  0x2d   : > { %v305_v19 = vadd.f32 %v303_v11, %v296_v16  ;;  %v297_v20 = vadd.f32 %v295_v15, %v288_v17 }
  0x2f   : > { %v307_v21 = vmax.f32 %v305_v19, 0.0  ;;  %v306_v22 = vadd.f32 %v304_v18, %v297_v20 }
  0x31   : > { %553 = vmatprep.mubr.msk.f32.mxu0 %vm324_vm0, %v307_v21  ;;  %v308_v23 = vmax.f32 %v306_v22, 0.0 }
  0x33   : > { %554 = vmatmul.mubr.msk.f32.vlgmr.msra.gmra.mrb[0].mxu0 %vm324_vm0, %v308_v23 }
 0x106   : > { %v555_v25 = vpop.f32.mrb[0].mxu0 }
 0x107   : > { %v403_v26 = vadd.f32 %v555_v25, %v518_v24  ;;  %v397_v27 = vpop.f32.mrb[1].mxu0 }
 0x108   : > { %v398_v28 = vadd.f32 %v518_v24, %v397_v27 }
 0x109   : > { %407 = vst [vmem:[%s217_s7 + $0x8] sm:$0xff] %v403_v26 }
 0x10a   : > { %406 = vst [vmem:[%s217_s7] sm:$0xff] %v398_v28 }
 0x10b   : > { %627 = shalt.err (!%p624_p3)
}
 0x10c   : > { %s628_s23 = scalar_lea.hbm %s878_s12, 256  ;;  %s632_s13 = scalar_lea.hbm %s926_s5, 512 }
 0x10d   : > { %p629_p4 = scmp.ne.s32.totalorder %s878_s12, %s628_s23  ;;  %p633_p9 = scmp.lt.u32.totalorder %s878_s12, %s926_s5 }
 0x10e   : > { %p634_p10 = scmp.lt.u32.totalorder %s632_s13, %s628_s23  ;;  %p636_p12 = scmp.lt.u32.totalorder %s628_s23, %s878_s12 }
 0x10f   : > { %p630_p7 = pnand %p629_p4, %p749_p5 }
 0x110   : > { %p635_p11 = por %p634_p10, %p633_p9 }
 0x111   : > { %p631_p8 = pneg %p630_p7 }
 0x112   : > { %p637_p13 = por %p636_p12, %p635_p11 }
 0x114   : > { %p638_p0 = pnand %p637_p13, %p631_p8 }
 0x116   : > { %641 = shalt.err (!%p638_p0)
}
 0x117   : > { %s679_s7 = smov 128   ;;  %s680_s9 = smov 8  }
 0x118   : > { %573 = dma.vmem_to_hbm [thread:$0]  (%p749_p5), %s873_s8, 256, %s878_s12, %s880_s14, %s679_s7, %s679_s7, %s680_s9  }
 0x119 PF: > { %p579_p1 = scmp.ge.s32.totalorder %s676_s21, 2  ;;  %s437_s10 = sand.u32 1, %s664_s18  }
 0x11a   : > { %s438_s11 = scalar_lea.sflag [#allocation3], %s437_s10 }
 0x11b   : > { %p576_p2 = pnand %p579_p1, %p753_p6 }
 0x11d   : > { %659 = dma.done.wait (!%p576_p2), %s438_s11, 256  }
 0x11e   : > { %661 = vsyncadd (!%p576_p2), %s438_s11, 4294967040  ;;  %p15_p3 = scmp.ge.s32.totalorder %s736_s24, 4   ;;  %s929_s18 = smov %s668_s19 }
 0x11f   : > { %s930_s19 = smov %s672_s20  ;;  %s931_s20 = smov %s747_s27 }
 0x120   : > { %s932_s21 = smov %s736_s24  ;;  %17 = sbr.rel (!%p15_p3) target bundleno = 3 (0x3), region = 85 }
 0x127   :  { %443 = vsyncpa [#allocation3], 1 }
 0x128   :  { %445 = vsyncpa [#allocation3 + $0x1], 1 }

</bundles_post_ra>
